<compile_context>
chip_gen: v6e
topology: v6e:2x2x1
jax: 0.10.0
libtpu: 0.0.40
codegen_flags: <defaults>
</compile_context>

<pallas_src>
import jax
import jax.numpy as jnp
import numpy as np
from jax.experimental import pallas as pl
from jax.experimental.pallas import tpu as pltpu


def _make_kernel(H, W, Hp, Wp_pad, D):
    def kernel(xpad_ref, wcomb_ref, bias_ref, out_ref):
        # xpad_ref  : (1, Hp, Wp_pad, D)  zero-padded input, one batch element
        # wcomb_ref : (D, 81)             fused dw*pw weights, column = 9*k + j
        # bias_ref  : (1, 9)              pointwise bias (f32)
        # out_ref   : (1, H, W, 9)        softmax affinity Q
        x = xpad_ref[0]                            # (Hp, Wp_pad, D)
        x2 = x.reshape(Hp * Wp_pad, D)             # free view (Wp_pad % 8 == 0)

        # One fused MXU matmul: all 9 taps x 9 output channels at once.
        L = jnp.dot(x2, wcomb_ref[...],
                    preferred_element_type=jnp.float32)   # (Hp*Wp_pad, 81) f32
        L3 = L.reshape(Hp, Wp_pad, 81)                    # free view

        # 9 shifted slice-adds on the small f32 buffer (tap k = 3*dy + dx).
        acc = None
        k = 0
        for dy in range(3):
            for dx in range(3):
                tap = L3[dy:dy + H, dx:dx + W, 9 * k:9 * (k + 1)]   # (H, W, 9)
                acc = tap if acc is None else acc + tap
                k += 1
        logits = acc + bias_ref[...].astype(jnp.float32).reshape(1, 1, 9)

        # Softmax over the 9 neighbour logits (EUP exp + approx reciprocal).
        m = jnp.max(logits, axis=-1, keepdims=True)
        e = jnp.exp(logits - m)
        s = jnp.sum(e, axis=-1, keepdims=True)
        q = e * pl.reciprocal(s, approx=True)
        out_ref[0] = q.astype(out_ref.dtype)

    return kernel


def regproxy_affinity_forward(tok2d, dw_w, pw_w, pw_b,
                              compute_dtype=jnp.bfloat16):
    """
    tok2d : (B, H, W, D)  patch-token feature grid (channels-last)
    dw_w  : (3, 3, D)     depthwise 3x3 conv weight, dw_w[dy, dx, d]
    pw_w  : (9, D)        pointwise 1x1 conv weight
    pw_b  : (9,)          pointwise conv bias
    returns Q : (B, H, W, 9) float32, softmax over last dim
    """
    B, H, W, D = tok2d.shape
    Hp = H + 2
    Wp = W + 2
    Wp_pad = ((Wp + 7) // 8) * 8          # sublane-aligned padded width

    # Zero pad ('SAME') + extra zero columns up to Wp_pad; cast for the MXU.
    xpad = jnp.pad(tok2d, ((0, 0), (1, 1), (1, 1 + Wp_pad - Wp), (0, 0)))
    xpad = xpad.astype(compute_dtype)

    # Fused depthwise*pointwise weight: W_comb[d, 9*k + j] = dw[k, d] * pw[j, d]
    dww9 = dw_w.reshape(9, D).astype(jnp.float32)                    # k = 3*dy+dx
    prod = dww9[:, None, :] * pw_w.astype(jnp.float32)[None, :, :]   # (k, j, D)
    w_comb = jnp.transpose(prod, (2, 0, 1)).reshape(D, 81).astype(compute_dtype)
    bias = pw_b.reshape(1, 9).astype(jnp.float32)

    kernel = _make_kernel(H, W, Hp, Wp_pad, D)

    return pl.pallas_call(
        kernel,
        out_shape=jax.ShapeDtypeStruct((B, H, W, 9), jnp.float32),
        grid_spec=pltpu.PrefetchScalarGridSpec(
            num_scalar_prefetch=0,
            grid=(B,),
            in_specs=[
                pl.BlockSpec((1, Hp, Wp_pad, D), lambda b: (b, 0, 0, 0)),
                pl.BlockSpec((D, 81), lambda b: (0, 0)),
                pl.BlockSpec((1, 9), lambda b: (0, 0)),
            ],
            out_specs=pl.BlockSpec((1, H, W, 9), lambda b: (b, 0, 0, 0)),
        ),
        # NOTE (v7x, B == 1): to feed both TensorCores one would add a second
        # 'parallel' grid axis over H row-tiles with a 1-row halo; with B >= 2
        # the batch axis already parallelizes across cores.
        compiler_params=pltpu.CompilerParams(
            dimension_semantics=("parallel",),
            vmem_limit_bytes=32 * 1024 * 1024),
    )(xpad, w_comb, bias)


def regproxy_affinity_forward_ref(tok2d, dw_w, pw_w, pw_b):
    """Pure-JAX reference (matches PyTorch dw-conv -> pw-conv -> softmax)."""
    D = tok2d.shape[-1]
    rhs = dw_w[:, :, None, :]                                   # (3,3,1,D) HWIO
    y = jax.lax.conv_general_dilated(
        tok2d, rhs, window_strides=(1, 1), padding="SAME",
        dimension_numbers=("NHWC", "HWIO", "NHWC"),
        feature_group_count=D)
    logits = jnp.einsum("bhwd,kd->bhwk", y, pw_w) + pw_b
    return jax.nn.softmax(logits, axis=-1)


if __name__ == "__main__":
    B, H, W, D = 2, 8, 8, 128   # small shapes; module default is H=W=24, D=1024

    key = jax.random.PRNGKey(0)
    k1, k2, k3 = jax.random.split(key, 3)

    tok2d = jax.random.normal(k1, (B, H, W, D), dtype=jnp.float32)
    # PyTorch parameter shapes: dw (D,1,3,3) no bias, pw (9,D,1,1) + zero bias.
    dw_w = jax.random.normal(k2, (3, 3, D), dtype=jnp.float32) * 0.2
    pw_w = jax.random.normal(k3, (9, D), dtype=jnp.float32) * 0.2
    pw_b = jnp.zeros((9,), dtype=jnp.float32)   # nn.init.zeros_(self.pw.bias)

    q_ref = regproxy_affinity_forward_ref(tok2d, dw_w, pw_w, pw_b)

    # f32 compute path: numerics sanity check of the fused kernel.
    q32 = regproxy_affinity_forward(tok2d, dw_w, pw_w, pw_b,
                                    compute_dtype=jnp.float32)
    q32 = jax.block_until_ready(q32)
    np.testing.assert_allclose(np.asarray(q32), np.asarray(q_ref),
                               atol=5e-3, rtol=0)

    # bf16 compute path (default, HBM-optimized).
    q = regproxy_affinity_forward(tok2d, dw_w, pw_w, pw_b)
    q = jax.block_until_ready(q)
    assert q.shape == (B, H, W, 9)
    np.testing.assert_allclose(np.asarray(q), np.asarray(q_ref),
                               atol=2e-2, rtol=0)
    np.testing.assert_allclose(np.asarray(q).sum(-1), 1.0, atol=5e-3)

    print("KERNEL_OK")
</pallas_src>

<mosaic_0001>
module attributes {stable_mosaic.version = 11 : i64} {
  func.func @kernel(%arg0: i32, %arg1: memref<1x10x16x128xf32, #tpu.memory_space<vmem>>, %arg2: memref<128x81xf32, #tpu.memory_space<vmem>>, %arg3: memref<1x9xf32, #tpu.memory_space<vmem>>, %arg4: memref<1x8x8x9xf32, #tpu.memory_space<vmem>>) attributes {dimension_semantics = [#tpu.dimension_semantics<parallel>], iteration_bounds = array<i64: 2>, scalar_prefetch = 0 : i64, scratch_operands = 0 : i64, tpu.core_type = #tpu.core_type<tc>, window_params = [{transform_indices = @transform_0, window_bounds = array<i64: 1, 10, 16, 128>}, {pipeline_mode = #tpu.pipeline_mode<synchronous>, transform_indices = @transform_1, window_bounds = array<i64: 128, 81>}, {pipeline_mode = #tpu.pipeline_mode<synchronous>, transform_indices = @transform_2, window_bounds = array<i64: 1, 9>}, {transform_indices = @transform_3, window_bounds = array<i64: 1, 8, 8, 9>}]} {
    %c0 = arith.constant 0 : index
    %c0_0 = arith.constant 0 : index
    %c0_1 = arith.constant 0 : index
    %c0_2 = arith.constant 0 : index
    %0 = vector.load %arg1[%c0, %c0_0, %c0_1, %c0_2] : memref<1x10x16x128xf32, #tpu.memory_space<vmem>>, vector<1x10x16x128xf32>
    %1 = vector.shape_cast %0 : vector<1x10x16x128xf32> to vector<10x16x128xf32>
    %2 = vector.shape_cast %1 : vector<10x16x128xf32> to vector<160x128xf32>
    %c0_3 = arith.constant 0 : index
    %c0_4 = arith.constant 0 : index
    %3 = vector.load %arg2[%c0_3, %c0_4] : memref<128x81xf32, #tpu.memory_space<vmem>>, vector<128x81xf32>
    %cst = arith.constant dense<0.000000e+00> : vector<160x81xf32>
    %4 = tpu.matmul %2, %3, %cst {dimension_numbers = #tpu.dot_dimension_numbers<[1], [0], [0], [1], [0, 0, 1, 1], [], []>} : vector<160x128xf32>, vector<128x81xf32>, vector<160x81xf32> -> vector<160x81xf32>
    %5 = vector.shape_cast %4 : vector<160x81xf32> to vector<10x16x81xf32>
    %6 = vector.extract_strided_slice %5 {offsets = [0, 0, 0], sizes = [8, 8, 9], strides = [1, 1, 1]} : vector<10x16x81xf32> to vector<8x8x9xf32>
    %7 = vector.extract_strided_slice %5 {offsets = [0, 1, 9], sizes = [8, 8, 9], strides = [1, 1, 1]} : vector<10x16x81xf32> to vector<8x8x9xf32>
    %8 = arith.addf %6, %7 : vector<8x8x9xf32>
    %9 = vector.extract_strided_slice %5 {offsets = [0, 2, 18], sizes = [8, 8, 9], strides = [1, 1, 1]} : vector<10x16x81xf32> to vector<8x8x9xf32>
    %10 = arith.addf %8, %9 : vector<8x8x9xf32>
    %11 = vector.extract_strided_slice %5 {offsets = [1, 0, 27], sizes = [8, 8, 9], strides = [1, 1, 1]} : vector<10x16x81xf32> to vector<8x8x9xf32>
    %12 = arith.addf %10, %11 : vector<8x8x9xf32>
    %13 = vector.extract_strided_slice %5 {offsets = [1, 1, 36], sizes = [8, 8, 9], strides = [1, 1, 1]} : vector<10x16x81xf32> to vector<8x8x9xf32>
    %14 = arith.addf %12, %13 : vector<8x8x9xf32>
    %15 = vector.extract_strided_slice %5 {offsets = [1, 2, 45], sizes = [8, 8, 9], strides = [1, 1, 1]} : vector<10x16x81xf32> to vector<8x8x9xf32>
    %16 = arith.addf %14, %15 : vector<8x8x9xf32>
    %17 = vector.extract_strided_slice %5 {offsets = [2, 0, 54], sizes = [8, 8, 9], strides = [1, 1, 1]} : vector<10x16x81xf32> to vector<8x8x9xf32>
    %18 = arith.addf %16, %17 : vector<8x8x9xf32>
    %19 = vector.extract_strided_slice %5 {offsets = [2, 1, 63], sizes = [8, 8, 9], strides = [1, 1, 1]} : vector<10x16x81xf32> to vector<8x8x9xf32>
    %20 = arith.addf %18, %19 : vector<8x8x9xf32>
    %21 = vector.extract_strided_slice %5 {offsets = [2, 2, 72], sizes = [8, 8, 9], strides = [1, 1, 1]} : vector<10x16x81xf32> to vector<8x8x9xf32>
    %22 = arith.addf %20, %21 : vector<8x8x9xf32>
    %c0_5 = arith.constant 0 : index
    %c0_6 = arith.constant 0 : index
    %23 = vector.load %arg3[%c0_5, %c0_6] : memref<1x9xf32, #tpu.memory_space<vmem>>, vector<1x9xf32>
    %24 = vector.shape_cast %23 : vector<1x9xf32> to vector<1x1x9xf32>
    %25 = vector.broadcast %24 : vector<1x1x9xf32> to vector<8x8x9xf32>
    %26 = arith.addf %22, %25 : vector<8x8x9xf32>
    %cst_7 = arith.constant dense<0xFF800000> : vector<8x8xf32>
    %27 = vector.multi_reduction <maximumf>, %26, %cst_7 [2] : vector<8x8x9xf32> to vector<8x8xf32>
    %28 = vector.shape_cast %27 : vector<8x8xf32> to vector<8x8x1xf32>
    %29 = vector.broadcast %28 : vector<8x8x1xf32> to vector<8x8x9xf32>
    %30 = arith.subf %26, %29 : vector<8x8x9xf32>
    %31 = math.exp %30 : vector<8x8x9xf32>
    %cst_8 = arith.constant dense<0.000000e+00> : vector<8x8xf32>
    %32 = vector.multi_reduction <add>, %31, %cst_8 [2] : vector<8x8x9xf32> to vector<8x8xf32>
    %33 = vector.shape_cast %32 : vector<8x8xf32> to vector<8x8x1xf32>
    %34 = tpu.reciprocal %33 {approx = true} : vector<8x8x1xf32> -> vector<8x8x1xf32>
    %35 = vector.broadcast %34 : vector<8x8x1xf32> to vector<8x8x9xf32>
    %36 = arith.mulf %31, %35 : vector<8x8x9xf32>
    %c0_9 = arith.constant 0 : index
    %c0_10 = arith.constant 0 : index
    %c0_11 = arith.constant 0 : index
    %c0_12 = arith.constant 0 : index
    %37 = vector.load %arg4[%c0_9, %c0_10, %c0_11, %c0_12] : memref<1x8x8x9xf32, #tpu.memory_space<vmem>>, vector<1x8x8x9xf32>
    %38 = vector.shape_cast %37 : vector<1x8x8x9xf32> to vector<8x8x9xf32>
    %39 = vector.shape_cast %36 : vector<8x8x9xf32> to vector<1x8x8x9xf32>
    tpu.vector_store %arg4[%c0_9, %c0_10, %c0_11, %c0_12], %39 {strides = array<i32>} : memref<1x8x8x9xf32, #tpu.memory_space<vmem>>, vector<1x8x8x9xf32>,
    return
  }
  func.func @transform_0(%arg0: i32) -> (i32, i32, i32, i32) {
    %c0_i32 = arith.constant 0 : i32
    %c0_i32_0 = arith.constant 0 : i32
    %c0_i32_1 = arith.constant 0 : i32
    %c0_i32_2 = arith.constant 0 : i32
    return %arg0, %c0_i32, %c0_i32_0, %c0_i32_1 : i32, i32, i32, i32
  }
  func.func @transform_1(%arg0: i32) -> (i32, i32) {
    %c0_i32 = arith.constant 0 : i32
    %c0_i32_0 = arith.constant 0 : i32
    %c0_i32_1 = arith.constant 0 : i32
    return %c0_i32, %c0_i32_0 : i32, i32
  }
  func.func @transform_2(%arg0: i32) -> (i32, i32) {
    %c0_i32 = arith.constant 0 : i32
    %c0_i32_0 = arith.constant 0 : i32
    %c0_i32_1 = arith.constant 0 : i32
    return %c0_i32, %c0_i32_0 : i32, i32
  }
  func.func @transform_3(%arg0: i32) -> (i32, i32, i32, i32) {
    %c0_i32 = arith.constant 0 : i32
    %c0_i32_0 = arith.constant 0 : i32
    %c0_i32_1 = arith.constant 0 : i32
    %c0_i32_2 = arith.constant 0 : i32
    return %arg0, %c0_i32, %c0_i32_0, %c0_i32_1 : i32, i32, i32, i32
  }
}

</mosaic_0001>

<bundles_post_ra>
// kernel: tpu_custom_call.1
= control target key start
LH: loop header
LB: loop body
LE: loop exit
PB: predicated region body
PF: predicated region fallthrough
CT: control target
= control target key end

     0   :  { %8 = vsyncpa [#allocation3], 0  ;;  %s1752_s0 = inlined_call_operand.hbm [shape: f32[2,10,16,128], index: 0, kind: input, shape index: {}]   ;;  %s1753_s1 = inlined_call_operand.vmem [shape: f32[128,81], index: 1, kind: input, shape index: {}]   ;;  %s1754_s2 = inlined_call_operand.vmem [shape: f32[1,9], index: 2, kind: input, shape index: {}]   ;;  %s1755_s3 = inlined_call_operand.hbm [shape: f32[2,8,8,9], index: 3, kind: output, shape index: {}]  }
   0x1   :  { %10 = vsyncpa [#allocation3 + $0x1], 0 }
   0x2   :  { %11 = vsyncpa [#allocation4], 0 }
   0x3   :  { %13 = vsyncpa [#allocation4 + $0x1], 0  ;;  %s1291_s12 = smov 0   ;;  %s1293_s13 = smov 0  }
   0x4   :  { %s1295_s14 = smov 0   ;;  %s1297_s15 = smov 0  }
   0x5 LB: > { %s1312_s16 = sadd.s32 4294967295, %s1255_s15   ;;  %s927_s17 = sadd.s32 4294967294, %s1255_s15   ;;  %s1255_s15 = sphi %s1297_s15, %s1769_s15   ;;  %s1251_s14 = sphi %s1295_s14, %s1768_s14   ;;  %s1247_s13 = sphi %s1293_s13, %s1767_s13   ;;  %s1243_s12 = sphi %s1291_s12, %s1766_s12  }
   0x6   : > { %s1316_s18 = sadd.s32 1, %s1255_s15   ;;  %s26_s19 = sadd.s32 1, %s1251_s14 }
   0x7   : > { %s23_s20 = ssub.s32 %s1255_s15, %s1316_s18  ;;  %p33_p0 = scmp.ne.s32.totalorder %s1251_s14, %s1247_s13 }
   0x8   : > { %p24_p1 = scmp.eq.s32.totalorder %s23_s20, 0  ;;  %p34_p2 = scmp.eq.s32.totalorder %s1255_s15, 0 }
   0x9   : > { %p39_p3 = scmp.ne.s32.totalorder %s1247_s13, %s1243_s12  ;;  %p40_p4 = scmp.eq.s32.totalorder %s1312_s16, 0 }
   0xa   : > { %s1328_s21 = scalar_select %p24_p1, %s1251_s14, %s26_s19  }
   0xb   : > { %p35_p5 = por %p34_p2, %p33_p0  ;;  %p1330_p6 = por %p40_p4, %p39_p3 }
   0xc   : > { %p105_p7 = scmp.eq.s32.totalorder %s1312_s16, 1  ;;  %p111_p8 = scmp.eq.s32.totalorder %s927_s17, 1 }
   0xd   : > { %s1758_s22 = scalar_select %p1330_p6, 1, 0 }
   0xe   : > { %p1085_p10 = scmp.lt.s32.totalorder %s1255_s15, 2  ;;  %p1337_p11 = por %p105_p7, %p33_p0 }
   0xf   : > { %p1341_p12 = por %p111_p8, %p39_p3  ;;  %s137_s25 = sand.u32 1, %s1251_s14  }
  0x10   : > { %s1759_s23 = scalar_select %p1337_p11, 1, 0 }
  0x11   : > { %s1760_s24 = scalar_select %p1341_p12, 1, 0 }
  0x12   : > { %s1071_s26 = smul.u32 2560, %s1255_s15  ;;  %p1352_p13 = pnand %p1085_p10, %p35_p5 }
  0x13   : > { %s1070_s27 = smul.u32 160, %s137_s25  ;;  %s1358_s7 = scalar_lea.sflag [#allocation3], %s137_s25 }
  0x14   : > { %s1350_s30 = scalar_lea.hbm %s1752_s0, %s1071_s26  ;;  %p1165_p1 = pneg %p1352_p13 }
  0x15   : > { %s141_s5 = scalar_lea.vmem [#allocation2], %s1070_s27  ;;  %s1163_s8 = scalar_lea.hbm %s1350_s30, 2560 }
  0x16   : > { %s148_s6 = sshll.u32 %s141_s5, 4  ;;  %p1164_p0 = scmp.ne.s32.totalorder %s1350_s30, %s1163_s8  ;;  %s1356_s6 = int_to_ptr.vmem [resolvable:$true] %s148_s6 }
  0x17   : > { %s1168_s11 = scalar_lea.hbm %s1752_s0, 5120  ;;  %p1169_p4 = scmp.lt.s32.totalorder %s1350_s30, %s1752_s0 }
  0x18   : > { %p1166_p2 = pnand %p1165_p1, %p1164_p0  ;;  %p1170_p5 = scmp.lt.s32.totalorder %s1168_s11, %s1163_s8 }
  0x1a   : > { %p1167_p3 = pneg %p1166_p2  ;;  %p1171_p7 = por %p1170_p5, %p1169_p4 }
  0x1c   : > { %p1172_p8 = pnand %p1171_p7, %p1167_p3 }
  0x1e   : > { %1175 = shalt.err (!%p1172_p8)
}
  0x1f   : > { %s1176_s20 = scalar_lea.vmem %s1356_s6, 2560  ;;  %s1257_s25 = smov [#allocation2]  }
  0x20   : > { %p1177_p10 = scmp.ne.s32.totalorder %s1356_s6, %s1176_s20  ;;  %s1181_s26 = sshll.u32 %s1257_s25, 4  ;;  %s1182_s26 = int_to_ptr.vmem [resolvable:$false] %s1181_s26 }
  0x21   : > { %s1183_s27 = scalar_lea.vmem %s1182_s26, 5120  ;;  %p1184_p2 = scmp.lt.s32.totalorder %s1356_s6, %s1182_s26 }
  0x22   : > { %p1179_p9 = pnand %p1177_p10, %p1165_p1  ;;  %p1185_p12 = scmp.lt.s32.totalorder %s1183_s27, %s1176_s20 }
  0x24   : > { %p1180_p0 = pneg %p1179_p9  ;;  %p1186_p11 = por %p1185_p12, %p1184_p2 }
  0x26   : > { %p1187_p6 = pnand %p1186_p11, %p1180_p0 }
  0x28   : > { %1190 = shalt.err (!%p1187_p6)
}
  0x29   : > { %s1258_s28 = smov 128   ;;  %s1259_s29 = smov 8  }
  0x2a   : > { %1080 = dma.hbm_to_vmem [thread:$0]  (!%p1352_p13), %s1350_s30, 2560, %s1356_s6, %s1358_s7, %s1258_s28, %s1258_s28, %s1259_s29  }
  0x2b   : > { %p931_p9 = scmp.ge.s32.totalorder %s1255_s15, 1  ;;  %p156_p1 = scmp.lt.s32.totalorder %s1255_s15, 3 }
  0x2d   : > { %p157_p3 = pnand %p931_p9, %p156_p1 }
  0x2e   : > { %s1382_s5 = sand.u32 (!%p157_p3), 1, %s1247_s13   ;;  %p1762_p6 = scmp.ne.s32.totalorder (!%p157_p3), %s1758_s22, 0 }
  0x2f   : > { %160 = sbr.rel (%p157_p3) target bundleno = 856 (0x358), region = 32  ;;  %s163_s9 = scalar_lea.sflag (!%p157_p3), [#allocation3], %s1382_s5 }
  0x30   : > { %s1072_s8 = smul.u32 (!%p157_p3), 160, %s1382_s5 }
  0x32   : > { %s1386_s10 = scalar_lea.vmem (!%p157_p3), [#allocation2], %s1072_s8 }
  0x34   : > { %1234 = dma.done.wait (%p1762_p6), %s163_s9, 2560  }
  0x35   : > { %1236 = vsyncadd (%p1762_p6), %s163_s9, 4294964736  ;;  %v224_v0 = vld [vmem:[%s1753_s1 + $0x78] sm:$0xff]  ;;  %v223_v1 = vld [vmem:[%s1753_s1 + $0x70] sm:$0xff]  ;;  %vm406_vm0 = vcmask 1046528   ;;  %s1260_s30 = smov 74   ;;  %s1261_s4 = smov 101  }
  0x36   : > { %976 = vmatprep.subr.mxu0 %v224_v0  ;;  %1038 = vmatprep.subr.mxu1 %v224_v0  ;;  %v222_v2 = vld [vmem:[%s1753_s1 + $0x68] sm:$0xff]  ;;  %v221_v3 = vld [vmem:[%s1753_s1 + $0x60] sm:$0xff]  ;;  %v220_v4 = vld [vmem:[%s1753_s1 + $0x58] sm:$0xff]  ;;  %vm463_vm1 = vcmask 1045504   ;;  %s1263_s6 = smov 110   ;;  %s1264_s7 = smov 65  }
  0x37   : > { %977 = vmatpush3.msra.mxu0 %v224_v0  ;;  %1054 = vmatpush3.msra.mxu1 %v224_v0  ;;  %v219_v5 = vld [vmem:[%s1753_s1 + $0x50] sm:$0xff]  ;;  %v218_v6 = vld [vmem:[%s1753_s1 + $0x48] sm:$0xff]  ;;  %v217_v7 = vld [vmem:[%s1753_s1 + $0x40] sm:$0xff]  ;;  %s1265_s11 = smov 92   ;;  %s1266_s17 = smov 56   ;;  %vm743_vm2 = vcmask 72704  }
  0x38   : > { %978 = vmatprep.subr.mxu0 %v223_v1  ;;  %1039 = vmatprep.subr.mxu1 %v223_v1  ;;  %v216_v8 = vld [vmem:[%s1753_s1 + $0x38] sm:$0xff]  ;;  %v215_v9 = vld [vmem:[%s1753_s1 + $0x30] sm:$0xff]  ;;  %v214_v10 = vld [vmem:[%s1753_s1 + $0x28] sm:$0xff]  ;;  %s1267_s22 = smov 83   ;;  %s932_s25 = sshll.u32 %s1382_s5, 6 }
  0x39   : > { %979 = vmatpush3.msra.mxu0 %v223_v1  ;;  %1055 = vmatpush3.msra.mxu1 %v223_v1  ;;  %v213_v11 = vld [vmem:[%s1753_s1 + $0x20] sm:$0xff]  ;;  %v212_v12 = vld [vmem:[%s1753_s1 + $0x18] sm:$0xff]  ;;  %v211_v13 = vld [vmem:[%s1753_s1 + $0x10] sm:$0xff]  ;;  %s1684_s26 = scalar_lea.vmem [#allocation5], %s932_s25  ;;  %s939_s27 = sshll.u32 %s1312_s16, 10 }
  0x3a   : > { %980 = vmatprep.subr.mxu0 %v222_v2  ;;  %1040 = vmatprep.subr.mxu1 %v222_v2  ;;  %v210_v14 = vld [vmem:[%s1753_s1 + $0x8] sm:$0xff]  ;;  %v209_v15 = vld [vmem:[%s1753_s1] sm:$0xff]  ;;  %v199_v17 = vld [vmem:[%s1386_s10 + $0x50] sm:$0xff]  ;;  %s854_s28 = sshll.u32 %s1684_s26, 4  ;;  %s1703_s9 = scalar_lea.hbm %s1755_s3, %s939_s27  ;;  %s1705_s28 = int_to_ptr.vmem [resolvable:$true] %s854_s28 }
  0x3b   : > { %981 = vmatpush3.msra.mxu0 %v222_v2  ;;  %1056 = vmatpush3.msra.mxu1 %v222_v2  ;;  %v189_v16 = vld [vmem:[%s1386_s10] sm:$0xff]  ;;  %v190_v18 = vld [vmem:[%s1386_s10 + $0x8] sm:$0xff]  ;;  %v200_v19 = vld [vmem:[%s1386_s10 + $0x58] sm:$0xff]  ;;  %s841_s16 = scalar_lea.sflag [#allocation4], %s1382_s5  ;;  %p1763_p12 = scmp.ne.s32.totalorder %s1759_s23, 0 }
  0x3c   : > { %982 = vmatprep.subr.mxu0 %v221_v3  ;;  %1041 = vmatprep.subr.mxu1 %v221_v3  ;;  %v191_v20 = vld [vmem:[%s1386_s10 + $0x10] sm:$0xff]  ;;  %v201_v21 = vld [vmem:[%s1386_s10 + $0x60] sm:$0xff]  ;;  %v192_v22 = vld [vmem:[%s1386_s10 + $0x18] sm:$0xff] }
  0x3d   : > { %983 = vmatpush3.msra.mxu0 %v221_v3  ;;  %1057 = vmatpush3.msra.mxu1 %v221_v3  ;;  %v202_v23 = vld [vmem:[%s1386_s10 + $0x68] sm:$0xff]  ;;  %v193_v24 = vld [vmem:[%s1386_s10 + $0x20] sm:$0xff]  ;;  %v203_v25 = vld [vmem:[%s1386_s10 + $0x70] sm:$0xff] }
  0x3e   : > { %984 = vmatprep.subr.mxu0 %v220_v4  ;;  %1042 = vmatprep.subr.mxu1 %v220_v4  ;;  %v194_v26 = vld [vmem:[%s1386_s10 + $0x28] sm:$0xff]  ;;  %v204_v27 = vld [vmem:[%s1386_s10 + $0x78] sm:$0xff]  ;;  %v205_v28 = vld [vmem:[%s1386_s10 + $0x80] sm:$0xff] }
  0x3f   : > { %985 = vmatpush3.msra.mxu0 %v220_v4  ;;  %1058 = vmatpush3.msra.mxu1 %v220_v4  ;;  %v195_v29 = vld [vmem:[%s1386_s10 + $0x30] sm:$0xff]  ;;  %v206_v30 = vld [vmem:[%s1386_s10 + $0x88] sm:$0xff]  ;;  %v196_v31 = vld [vmem:[%s1386_s10 + $0x38] sm:$0xff] }
  0x40   : > { %986 = vmatprep.subr.mxu0 %v219_v5  ;;  %1043 = vmatprep.subr.mxu1 %v219_v5  ;;  %v197_v32 = vld [vmem:[%s1386_s10 + $0x40] sm:$0xff]  ;;  %v207_v33 = vld [vmem:[%s1386_s10 + $0x90] sm:$0xff]  ;;  %v198_v34 = vld [vmem:[%s1386_s10 + $0x48] sm:$0xff] }
  0x41   : > { %987 = vmatpush3.msra.mxu0 %v219_v5  ;;  %1059 = vmatpush3.msra.mxu1 %v219_v5  ;;  %v208_v35 = vld [vmem:[%s1386_s10 + $0x98] sm:$0xff]  ;;  %s1262_s10 = smov 119  }
  0x42   : > { %988 = vmatprep.subr.mxu0 %v218_v6  ;;  %1044 = vmatprep.subr.mxu1 %v218_v6 }
  0x43   : > { %989 = vmatpush3.msra.mxu0 %v218_v6  ;;  %1060 = vmatpush3.msra.mxu1 %v218_v6 }
  0x44   : > { %990 = vmatprep.subr.mxu0 %v217_v7  ;;  %1045 = vmatprep.subr.mxu1 %v217_v7 }
  0x45   : > { %991 = vmatpush3.msra.mxu0 %v217_v7  ;;  %1061 = vmatpush3.msra.mxu1 %v217_v7 }
  0x46   : > { %992 = vmatprep.subr.mxu0 %v216_v8  ;;  %1046 = vmatprep.subr.mxu1 %v216_v8 }
  0x47   : > { %993 = vmatpush3.msra.mxu0 %v216_v8  ;;  %1062 = vmatpush3.msra.mxu1 %v216_v8 }
  0x48   : > { %994 = vmatprep.subr.mxu0 %v215_v9  ;;  %1047 = vmatprep.subr.mxu1 %v215_v9 }
  0x49   : > { %995 = vmatpush3.msra.mxu0 %v215_v9  ;;  %1063 = vmatpush3.msra.mxu1 %v215_v9 }
  0x4a   : > { %996 = vmatprep.subr.mxu0 %v214_v10  ;;  %1048 = vmatprep.subr.mxu1 %v214_v10 }
  0x4b   : > { %997 = vmatpush3.msra.mxu0 %v214_v10  ;;  %1064 = vmatpush3.msra.mxu1 %v214_v10 }
  0x4c   : > { %998 = vmatprep.subr.mxu0 %v213_v11  ;;  %1049 = vmatprep.subr.mxu1 %v213_v11 }
  0x4d   : > { %999 = vmatpush3.msra.mxu0 %v213_v11  ;;  %1065 = vmatpush3.msra.mxu1 %v213_v11 }
  0x4e   : > { %1000 = vmatprep.subr.mxu0 %v212_v12  ;;  %1050 = vmatprep.subr.mxu1 %v212_v12 }
  0x4f   : > { %1001 = vmatpush3.msra.mxu0 %v212_v12  ;;  %1066 = vmatpush3.msra.mxu1 %v212_v12 }
  0x50   : > { %1002 = vmatprep.subr.mxu0 %v211_v13  ;;  %1051 = vmatprep.subr.mxu1 %v211_v13 }
  0x51   : > { %1003 = vmatpush3.msra.mxu0 %v211_v13  ;;  %1067 = vmatpush3.msra.mxu1 %v211_v13 }
  0x52   : > { %1004 = vmatprep.subr.mxu0 %v210_v14  ;;  %1052 = vmatprep.subr.mxu1 %v210_v14 }
  0x53   : > { %1005 = vmatpush3.msra.mxu0 %v210_v14  ;;  %1068 = vmatpush3.msra.mxu1 %v210_v14 }
  0x54   : > { %1006 = vmatprep.subr.mxu0 %v209_v15  ;;  %1053 = vmatprep.subr.mxu1 %v209_v15 }
  0x55   : > { %1007 = vmatpush3.msra.mxu0 %v209_v15  ;;  %1069 = vmatpush3.msra.mxu1 %v209_v15 }
  0x56   : > { %1008 = vmatprep.mubr.f32.mxu0 %v189_v16  ;;  %1023 = vmatprep.mubr.f32.mxu1 %v199_v17 }
  0x57   : > { %1009 = vmatmul.mubr.f32.vlgmr.msra.gmra.mxu0 %v190_v18  ;;  %1024 = vmatmul.mubr.f32.vlgmr.msra.gmra.mxu1 %v200_v19 }
  0x58   : > { %1011 = vmatprep.mubr.f32.mxu0 %v191_v20  ;;  %1026 = vmatprep.mubr.f32.mxu1 %v201_v21 }
  0x5b   : > { %1012 = vmatmul.mubr.f32.gmra.mxu0 %v192_v22  ;;  %1027 = vmatmul.mubr.f32.gmra.mxu1 %v202_v23 }
  0x5c   : > { %1014 = vmatprep.mubr.f32.mxu0 %v193_v24  ;;  %1029 = vmatprep.mubr.f32.mxu1 %v203_v25 }
  0x5f   : > { %1015 = vmatmul.mubr.f32.gmra.mxu0 %v194_v26  ;;  %1030 = vmatmul.mubr.f32.gmra.mxu1 %v204_v27 }
  0x60   : > { %1032 = vmatprep.mubr.f32.mxu1 %v205_v28  ;;  %1017 = vmatprep.mubr.f32.mxu0 %v195_v29 }
  0x63   : > { %1033 = vmatmul.mubr.f32.gmra.mxu1 %v206_v30  ;;  %1018 = vmatmul.mubr.f32.gmra.mxu0 %v196_v31 }
  0x64   : > { %1020 = vmatprep.mubr.f32.mxu0 %v197_v32  ;;  %1035 = vmatprep.mubr.f32.mxu1 %v207_v33 }
  0x67   : > { %1021 = vmatmul.mubr.f32.gmra.mxu0 %v198_v34  ;;  %1036 = vmatmul.mubr.f32.gmra.mxu1 %v208_v35 }
 0x117   : > { %v1010_v36 = vpop.f32.mrf.mxu0  ;;  %v1025_v37 = vpop.f32.mrf.mxu1 }
 0x118   : > { %v408_v38 = vrot.slane %v1010_v36, 1  ;;  %v423_v41 = vrot.slane %v1025_v37, 1  ;;  %v465_v46 = vrot.slane %v1010_v36, 2  ;;  %v480_v49 = vrot.slane %v1025_v37, 2 }
 0x119   : > { %v1460_v39 = vpop.f32.mrf.mxu0  ;;  %v1462_v40 = vpop.f32.mrf.mxu1 }
 0x11a   : > { %v407_v42 = vrot.slane %v1460_v39, 1  ;;  %631 = vrot.lane.b32.xlu1 %v1462_v40, %s1260_s30  ;;  %529 = vrot.lane.b32.xlu0 %v1462_v40, %s1261_s4  ;;  %v422_v43 = vrot.slane %v1462_v40, 1  ;;  %v464_v47 = vrot.slane %v1460_v39, 2  ;;  %v479_v48 = vrot.slane %v1462_v40, 2 }
 0x11b   : > { %v1013_v52 = vpop.f32.mrf.mxu0  ;;  %v1028_v53 = vpop.f32.mrf.mxu1 }
 0x11c   : > { %v424_v44 = vsel %vm406_vm0, %v422_v43, %v423_v41  ;;  %v409_v45 = vsel %vm406_vm0, %v407_v42, %v408_v38  ;;  %v481_v50 = vsel %vm463_vm1, %v479_v48, %v480_v49  ;;  %v466_v51 = vsel %vm463_vm1, %v464_v47, %v465_v46 }
 0x11d   : > { %v1484_v54 = vpop.f32.mrf.mxu0  ;;  %v1486_v55 = vpop.f32.mrf.mxu1  ;;  %v468_v56 = vrot.slane %v1013_v52, 2  ;;  %v411_v58 = vrot.slane %v1013_v52, 1  ;;  %v426_v60 = vrot.slane %v1028_v53, 1  ;;  %v483_v63 = vrot.slane %v1028_v53, 2 }
 0x11e   : > { %441 = vrot.lane.b32.xlu1 %v424_v44, %s1262_s10  ;;  %431 = vrot.lane.b32.xlu0 %v409_v45, %s1262_s10  ;;  %v467_v57 = vrot.slane %v1484_v54, 2  ;;  %v410_v59 = vrot.slane %v1484_v54, 1  ;;  %v425_v62 = vrot.slane %v1486_v55, 1  ;;  %v482_v2 = vrot.slane %v1486_v55, 2 }
 0x11f   : > { %v1016_v3 = vpop.f32.mrf.mxu0  ;;  %v1031_v6 = vpop.f32.mrf.mxu1 }
 0x120   : > { %v469_v61 = vsel %vm463_vm1, %v467_v57, %v468_v56  ;;  %v427_v0 = vsel %vm406_vm0, %v425_v62, %v426_v60  ;;  %v412_v1 = vsel %vm406_vm0, %v410_v59, %v411_v58  ;;  %v484_v4 = vsel %vm463_vm1, %v482_v2, %v483_v63 }
 0x121   : > { %v1507_v5 = vpop.f32.mrf.mxu0  ;;  %v1512_v7 = vpop.f32.mrf.mxu1  ;;  %v414_v8 = vrot.slane %v1016_v3, 1  ;;  %v429_v10 = vrot.slane %v1031_v6, 1  ;;  %v486_v13 = vrot.slane %v1031_v6, 2  ;;  %v471_v17 = vrot.slane %v1016_v3, 2 }
 0x122   : > { %498 = vrot.lane.b32.xlu1 %v481_v50, %s1263_s6  ;;  %488 = vrot.lane.b32.xlu0 %v466_v51, %s1263_s6  ;;  %v413_v9 = vrot.slane %v1507_v5, 1  ;;  %v428_v12 = vrot.slane %v1512_v7, 1  ;;  %v485_v15 = vrot.slane %v1512_v7, 2  ;;  %v470_v18 = vrot.slane %v1507_v5, 2 }
 0x123   : > { %v1034_v20 = vpop.f32.mrf.mxu1  ;;  %v1019_v21 = vpop.f32.mrf.mxu0 }
 0x124   : > { %v415_v11 = vsel %vm406_vm0, %v413_v9, %v414_v8  ;;  %v430_v14 = vsel %vm406_vm0, %v428_v12, %v429_v10  ;;  %v487_v16 = vsel %vm463_vm1, %v485_v15, %v486_v13  ;;  %v472_v19 = vsel %vm463_vm1, %v470_v18, %v471_v17 }
 0x125   : > { %v371_v22 = vpop.f32.mrf.mxu1  ;;  %v1541_v23 = vpop.f32.mrf.mxu0  ;;  %v417_v24 = vrot.slane %v1019_v21, 1  ;;  %v474_v27 = vrot.slane %v1019_v21, 2  ;;  %v555_v29 = vrot.slane %v1034_v20, 1  ;;  %v590_v32 = vrot.slane %v1034_v20, 2 }
 0x126   : > { %667 = vrot.lane.b32.xlu1 %v424_v44, %s1264_s7  ;;  %565 = vrot.lane.b32.xlu0 %v424_v44, %s1265_s11  ;;  %v416_v25 = vrot.slane %v1541_v23, 1  ;;  %v473_v28 = vrot.slane %v1541_v23, 2  ;;  %v554_v30 = vrot.slane %v371_v22, 1  ;;  %v589_v33 = vrot.slane %v371_v22, 2 }
 0x127   : > { %v1022_v36 = vpop.f32.mrf.mxu0  ;;  %v1037_v38 = vpop.f32.mrf.mxu1 }
 0x128   : > { %v418_v26 = vsel %vm406_vm0, %v416_v25, %v417_v24  ;;  %v475_v31 = vsel %vm463_vm1, %v473_v28, %v474_v27  ;;  %v556_v34 = vsel %vm406_vm0, %v554_v30, %v555_v29  ;;  %v591_v35 = vsel %vm463_vm1, %v589_v33, %v590_v32 }
 0x129   : > { %v1567_v37 = vpop.f32.mrf.mxu0  ;;  %v420_v41 = vrot.slane %v1022_v36, 1  ;;  %v381_v43 = vpop.f32.mrf.mxu1  ;;  %v477_v44 = vrot.slane %v1022_v36, 2  ;;  %v694_v56 = vrot.slane %v1037_v38, 2 }
 0x12a   : > { %702 = vrot.lane.b32.xlu1 %v481_v50, %s1266_s17  ;;  %600 = vrot.lane.b32.xlu0 %v481_v50, %s1267_s22  ;;  %v419_v42 = vrot.slane %v1567_v37, 1  ;;  %v476_v45 = vrot.slane %v1567_v37, 2  ;;  %v659_v50 = vrot.slane %v1037_v38, 1  ;;  %v658_v51 = vrot.slane %v381_v43, 1 }
 0x12b   : > { %v693_v57 = vrot.slane %v381_v43, 2 }
 0x12c   : > { %v421_v46 = vsel %vm406_vm0, %v419_v42, %v420_v41  ;;  %v478_v47 = vsel %vm463_vm1, %v476_v45, %v477_v44  ;;  %v660_v58 = vsel %vm406_vm0, %v658_v51, %v659_v50 }
 0x12d   : > { %v695_v63 = vsel %vm463_vm1, %v693_v57, %v694_v56 }
 0x12e   : > { %531 = vrot.lane.b32.xlu1 %v1486_v55, %s1261_s4  ;;  %521 = vrot.lane.b32.xlu0 %v1484_v54, %s1261_s4 }
 0x132   : > { %633 = vrot.lane.b32.xlu0 %v1486_v55, %s1260_s30  ;;  %490 = vrot.lane.b32.xlu1 %v469_v61, %s1263_s6 }
 0x136   : > { %567 = vrot.lane.b32.xlu1 %v427_v0, %s1265_s11  ;;  %433 = vrot.lane.b32.xlu0 %v412_v1, %s1262_s10 }
 0x13a   : > { %602 = vrot.lane.b32.xlu1 %v484_v4, %s1267_s22  ;;  %443 = vrot.lane.b32.xlu0 %v427_v0, %s1262_s10 }
 0x13e   : > { %500 = vrot.lane.b32.xlu0 %v484_v4, %s1263_s6  ;;  %523 = vrot.lane.b32.xlu1 %v1507_v5, %s1261_s4 }
 0x142   : > { %557 = vrot.lane.b32.xlu0 %v412_v1, %s1265_s11  ;;  %635 = vrot.lane.b32.xlu1 %v1512_v7, %s1260_s30 }
 0x146   : > { %592 = vrot.lane.b32.xlu0 %v469_v61, %s1267_s22  ;;  %435 = vrot.lane.b32.xlu1 %v415_v11, %s1262_s10 }
 0x14a   : > { %669 = vrot.lane.b32.xlu0 %v427_v0, %s1264_s7  ;;  %445 = vrot.lane.b32.xlu1 %v430_v14, %s1262_s10 }
 0x14e   : > { %704 = vrot.lane.b32.xlu0 %v484_v4, %s1266_s17  ;;  %502 = vrot.lane.b32.xlu1 %v487_v16, %s1263_s6 }
 0x152   : > { %533 = vrot.lane.b32.xlu0 %v1512_v7, %s1261_s4  ;;  %559 = vrot.lane.b32.xlu1 %v415_v11, %s1265_s11 }
 0x156   : > { %625 = vrot.lane.b32.xlu0 %v1507_v5, %s1260_s30  ;;  %594 = vrot.lane.b32.xlu1 %v472_v19, %s1267_s22 }
 0x15a   : > { %492 = vrot.lane.b32.xlu0 %v472_v19, %s1263_s6  ;;  %671 = vrot.lane.b32.xlu1 %v430_v14, %s1264_s7 }
 0x15e   : > { %569 = vrot.lane.b32.xlu0 %v430_v14, %s1265_s11  ;;  %706 = vrot.lane.b32.xlu1 %v487_v16, %s1266_s17 }
 0x162   : > { %604 = vrot.lane.b32.xlu0 %v487_v16, %s1267_s22  ;;  %535 = vrot.lane.b32.xlu1 %v371_v22, %s1261_s4 }
 0x166   : > { %661 = vrot.lane.b32.xlu0 %v415_v11, %s1264_s7  ;;  %627 = vrot.lane.b32.xlu1 %v1541_v23, %s1260_s30 }
 0x16a   : > { %696 = vrot.lane.b32.xlu0 %v472_v19, %s1266_s17  ;;  %437 = vrot.lane.b32.xlu1 %v418_v26, %s1262_s10 }
 0x16e   : > { %525 = vrot.lane.b32.xlu0 %v1541_v23, %s1261_s4  ;;  %494 = vrot.lane.b32.xlu1 %v475_v31, %s1263_s6 }
 0x172   : > { %637 = vrot.lane.b32.xlu0 %v371_v22, %s1260_s30  ;;  %571 = vrot.lane.b32.xlu1 %v556_v34, %s1265_s11 }
 0x176   : > { %561 = vrot.lane.b32.xlu0 %v418_v26, %s1265_s11  ;;  %606 = vrot.lane.b32.xlu1 %v591_v35, %s1267_s22 }
 0x17a   : > { %596 = vrot.lane.b32.xlu0 %v475_v31, %s1267_s22  ;;  %663 = vrot.lane.b32.xlu1 %v418_v26, %s1264_s7 }
 0x17e   : > { %673 = vrot.lane.b32.xlu0 %v556_v34, %s1264_s7  ;;  %698 = vrot.lane.b32.xlu1 %v475_v31, %s1266_s17 }
 0x182   : > { %629 = vrot.lane.b32.xlu0 %v1567_v37, %s1260_s30  ;;  %527 = vrot.lane.b32.xlu1 %v1567_v37, %s1261_s4  ;;  %s1268_s4 = smov [#allocation5]  }
 0x186   : > { %639 = vrot.lane.b32.xlu1 %v381_v43, %s1260_s30  ;;  %439 = vrot.lane.b32.xlu0 %v421_v46, %s1262_s10  ;;  %s1191_s30 = scalar_lea.vmem %s1705_s28, 1024  ;;  %s1195_s10 = sshll.u32 %s1268_s4, 4  ;;  %s1196_s10 = int_to_ptr.vmem [resolvable:$false] %s1195_s10 }
 0x187   : > { %p1192_p11 = scmp.ne.s32.totalorder %s1705_s28, %s1191_s30  ;;  %p1198_p5 = scmp.lt.s32.totalorder %s1705_s28, %s1196_s10 }
 0x189   : > { %p1193_p13 = pnand %p1192_p11, %p1763_p12 }
 0x18a   : > { %563 = vrot.lane.b32.xlu1 %v421_v46, %s1265_s11  ;;  %496 = vrot.lane.b32.xlu0 %v478_v47, %s1263_s6  ;;  %s1197_s6 = scalar_lea.vmem %s1196_s10, 2048 }
 0x18b   : > { %p1194_p4 = pneg %p1193_p13  ;;  %p1199_p7 = scmp.lt.s32.totalorder %s1197_s6, %s1191_s30 }
 0x18c   : > { %v1581_v48 = vpop.permute.xlu1 %631  ;;  %v1583_v49 = vpop.permute.xlu0 %529 }
 0x18d   : > { %p1200_p8 = por %p1199_p7, %p1198_p5 }
 0x18e   : > { %598 = vrot.lane.b32.xlu1 %v478_v47, %s1267_s22  ;;  %665 = vrot.lane.b32.xlu0 %v421_v46, %s1264_s7 }
 0x18f   : > { %p1201_p10 = pnand %p1200_p8, %p1194_p4 }
 0x190   : > { %v442_v52 = vpop.permute.xlu1 %441  ;;  %v432_v53 = vpop.permute.xlu0 %431 }
 0x191   : > { %v460_v59 = vadd.f32 %v442_v52, %v1462_v40  ;;  %v455_v33 = vadd.f32 %v432_v53, %v1460_v39 }
 0x192   : > { %675 = vrot.lane.b32.xlu1 %v660_v58, %s1264_s7  ;;  %700 = vrot.lane.b32.xlu0 %v478_v47, %s1266_s17 }
 0x194   : > { %v499_v60 = vpop.permute.xlu1 %498  ;;  %v489_v61 = vpop.permute.xlu0 %488 }
 0x195   : > { %v517_v62 = vadd.f32 %v499_v60, %v460_v59  ;;  %v512_v36 = vadd.f32 %v489_v61, %v455_v33  ;;  %v1626_v60 = vld [vmem:[%s1754_s2] ss:$0 sm:$0xff] }
 0x196   : > { %710 = vrot.lane.b32.xlu1 %v695_v63, %s1266_s17  ;;  %708 = vrot.lane.b32.xlu0 %v591_v35, %s1266_s17 }
 0x198   : > { %v1594_v0 = vpop.permute.xlu1 %667  ;;  %v1596_v1 = vpop.permute.xlu0 %565 }
 0x19c   : > { %v1598_v2 = vpop.permute.xlu1 %702  ;;  %v1600_v3 = vpop.permute.xlu0 %600 }
 0x1a0   : > { %v532_v4 = vpop.permute.xlu1 %531  ;;  %v522_v6 = vpop.permute.xlu0 %521 }
 0x1a1   : > { %v550_v38 = vadd.f32 %v532_v4, %v517_v62 }
 0x1a4   : > { %v1602_v40 = vpop.permute.xlu0 %633  ;;  %v491_v8 = vpop.permute.xlu1 %490 }
 0x1a8   : > { %v568_v9 = vpop.permute.xlu1 %567  ;;  %v434_v10 = vpop.permute.xlu0 %433 }
 0x1a9   : > { %v586_v43 = vadd.f32 %v568_v9, %v550_v38  ;;  %v456_v4 = vadd.f32 %v434_v10, %v1484_v54 }
 0x1ac   : > { %v603_v11 = vpop.permute.xlu1 %602  ;;  %v444_v12 = vpop.permute.xlu0 %443 }
 0x1ad   : > { %v461_v13 = vadd.f32 %v444_v12, %v1486_v55  ;;  %v621_v45 = vadd.f32 %v603_v11, %v586_v43 }
 0x1b0   : > { %v501_v14 = vpop.permute.xlu0 %500  ;;  %v524_v15 = vpop.permute.xlu1 %523 }
 0x1b1   : > { %v1605_v16 = vadd.f32 %v501_v14, %v461_v13  ;;  %v513_v13 = vadd.f32 %v491_v8, %v456_v4 }
 0x1b4   : > { %v558_v17 = vpop.permute.xlu0 %557  ;;  %v636_v18 = vpop.permute.xlu1 %635 }
 0x1b5   : > { %v654_v51 = vadd.f32 %v636_v18, %v621_v45 }
 0x1b8   : > { %v593_v19 = vpop.permute.xlu0 %592  ;;  %v1607_v20 = vpop.permute.xlu1 %435 }
 0x1bc   : > { %v1609_v21 = vpop.permute.xlu0 %669  ;;  %v446_v22 = vpop.permute.xlu1 %445 }
 0x1bd   : > { %v462_v24 = vadd.f32 %v446_v22, %v1512_v7  ;;  %v545_v7 = vadd.f32 %v522_v6, %v512_v36 }
 0x1bf   : > { %v581_v44 = vadd.f32 %v558_v17, %v545_v7  ;;  %v546_v17 = vadd.f32 %v524_v15, %v513_v13  ;;  %v457_v15 = vadd.f32 %v1607_v20, %v1507_v5 }
 0x1c0   : > { %v1612_v25 = vpop.permute.xlu0 %704  ;;  %v503_v26 = vpop.permute.xlu1 %502 }
 0x1c1   : > { %v1614_v27 = vadd.f32 %v503_v26, %v462_v24  ;;  %v616_v46 = vadd.f32 %v593_v19, %v581_v44 }
 0x1c4   : > { %v1616_v55 = vpop.permute.xlu0 %533  ;;  %v560_v28 = vpop.permute.xlu1 %559 }
 0x1c5   : > { %v582_v22 = vadd.f32 %v560_v28, %v546_v17 }
 0x1c8   : > { %v626_v29 = vpop.permute.xlu0 %625  ;;  %v595_v30 = vpop.permute.xlu1 %594 }
 0x1c9   : > { %v649_v52 = vadd.f32 %v626_v29, %v616_v46  ;;  %v617_v24 = vadd.f32 %v595_v30, %v582_v22 }
 0x1cc   : > { %v493_v31 = vpop.permute.xlu0 %492  ;;  %v672_v32 = vpop.permute.xlu1 %671 }
 0x1cd   : > { %v690_v56 = vadd.f32 %v672_v32, %v654_v51  ;;  %v514_v43 = vadd.f32 %v493_v31, %v457_v15 }
 0x1d0   : > { %v1619_v34 = vpop.permute.xlu0 %569  ;;  %v707_v35 = vpop.permute.xlu1 %706 }
 0x1d1   : > { %v725_v58 = vadd.f32 %v707_v35, %v690_v56 }
 0x1d3   : > { %v1635_v9 = vadd.f32 %v1626_v60, %v725_v58 }
 0x1d4   : > { %v1621_v41 = vpop.permute.xlu0 %604  ;;  %v536_v42 = vpop.permute.xlu1 %535 }
 0x1d5   : > { %v759_v14 = vsel %vm743_vm2, %v1635_v9, -inf  ;;  %v552_v58 = vadd.f32 %v536_v42, %v1614_v27 }
 0x1d8   : > { %v662_v47 = vpop.permute.xlu0 %661  ;;  %v628_v50 = vpop.permute.xlu1 %627 }
 0x1d9   : > { %v685_v57 = vadd.f32 %v662_v47, %v649_v52  ;;  %v650_v26 = vadd.f32 %v628_v50, %v617_v24 }
 0x1dc   : > { %v697_v39 = vpop.permute.xlu0 %696  ;;  %v438_v53 = vpop.permute.xlu1 %437 }
 0x1dd   : > { %v720_v59 = vadd.f32 %v697_v39, %v685_v57  ;;  %v458_v44 = vadd.f32 %v438_v53, %v1541_v23  ;;  %v551_v39 = vadd.f32 %v1616_v55, %v1605_v16 }
 0x1df   : > { %v1629_v61 = vadd.f32 %v1626_v60, %v720_v59  ;;  %v587_v23 = vadd.f32 %v1619_v34, %v551_v39 }
 0x1e0   : > { %v526_v62 = vpop.permute.xlu0 %525  ;;  %v495_v63 = vpop.permute.xlu1 %494 }
 0x1e1   : > { %v744_v6 = vsel %vm743_vm2, %v1629_v61, -inf  ;;  %v547_v45 = vadd.f32 %v526_v62, %v514_v43  ;;  %v515_v46 = vadd.f32 %v495_v63, %v458_v44 }
 0x1e2   : > { %745 = vmax.xlane.f32.xlu0 %v744_v6  ;;  %v622_v6 = vadd.f32 %v1621_v41, %v587_v23 }
 0x1e4   : > { %v638_v11 = vpop.permute.xlu0 %637  ;;  %v572_v12 = vpop.permute.xlu1 %571 }
 0x1e5   : > { %v588_v62 = vadd.f32 %v572_v12, %v552_v58  ;;  %v655_v42 = vadd.f32 %v638_v11, %v622_v6 }
 0x1e6   : > { %760 = vmax.xlane.f32.xlu0 %v759_v14 }
 0x1e8   : > { %v562_v18 = vpop.permute.xlu0 %561  ;;  %v607_v19 = vpop.permute.xlu1 %606 }
 0x1e9   : > { %v583_v52 = vadd.f32 %v562_v18, %v547_v45  ;;  %v623_v13 = vadd.f32 %v607_v19, %v588_v62 }
 0x1ec   : > { %v597_v54 = vpop.permute.xlu0 %596  ;;  %v664_v10 = vpop.permute.xlu1 %663 }
 0x1ed   : > { %v686_v29 = vadd.f32 %v664_v10, %v650_v26  ;;  %v618_v5 = vadd.f32 %v597_v54, %v583_v52 }
 0x1f0   : > { %v674_v32 = vpop.permute.xlu0 %673  ;;  %v699_v33 = vpop.permute.xlu1 %698 }
 0x1f1   : > { %v721_v35 = vadd.f32 %v699_v33, %v686_v29  ;;  %v691_v22 = vadd.f32 %v674_v32, %v655_v42 }
 0x1f3   : > { %v1640_v36 = vadd.f32 %v1626_v60, %v721_v35 }
 0x1f4   : > { %v630_v8 = vpop.permute.xlu0 %629  ;;  %v528_v38 = vpop.permute.xlu1 %527 }
 0x1f5   : > { %v747_v7 = vsel %vm743_vm2, %v1640_v36, -inf  ;;  %v548_v56 = vadd.f32 %v528_v38, %v515_v46 }
 0x1f6   : > { %748 = vmax.xlane.f32.xlu1 %v747_v7 }
 0x1f8   : > { %v640_v28 = vpop.permute.xlu1 %639  ;;  %v440_v30 = vpop.permute.xlu0 %439 }
 0x1f9   : > { %v459_v47 = vadd.f32 %v440_v30, %v1567_v37  ;;  %v651_v37 = vadd.f32 %v630_v8, %v618_v5  ;;  %v656_v17 = vadd.f32 %v640_v28, %v623_v13 }
 0x1fc   : > { %v564_v50 = vpop.permute.xlu1 %563  ;;  %v497_v51 = vpop.permute.xlu0 %496 }
 0x1fd   : > { %v516_v57 = vadd.f32 %v497_v51, %v459_v47  ;;  %v584_v20 = vadd.f32 %v564_v50, %v548_v56 }
 0x1ff   : > { %v549_v31 = vadd.f32 %v1583_v49, %v516_v57 }
 0x200   : > { %v599_v53 = vpop.permute.xlu1 %598  ;;  %v666_v59 = vpop.permute.xlu0 %665 }
 0x201   : > { %v585_v63 = vadd.f32 %v1596_v1, %v549_v31  ;;  %v619_v4 = vadd.f32 %v599_v53, %v584_v20  ;;  %v687_v55 = vadd.f32 %v666_v59, %v651_v37 }
 0x203   : > { %v620_v16 = vadd.f32 %v1600_v3, %v585_v63  ;;  %v652_v27 = vadd.f32 %v1581_v48, %v619_v4 }
 0x204   : > { %v676_v14 = vpop.permute.xlu1 %675  ;;  %v701_v49 = vpop.permute.xlu0 %700 }
 0x205   : > { %v688_v34 = vadd.f32 %v1594_v0, %v652_v27  ;;  %v722_v18 = vadd.f32 %v701_v49, %v687_v55  ;;  %v653_v12 = vadd.f32 %v1602_v40, %v620_v16  ;;  %v692_v1 = vadd.f32 %v676_v14, %v656_v17 }
 0x207   : > { %v737_v24 = vadd.f32 %v1626_v60, %v722_v18  ;;  %v689_v41 = vadd.f32 %v1609_v21, %v653_v12  ;;  %v723_v3 = vadd.f32 %v1598_v2, %v688_v34 }
 0x208   : > { %v711_v19 = vpop.permute.xlu1 %710  ;;  %v709_v48 = vpop.permute.xlu0 %708 }
 0x209   : > { %v727_v54 = vadd.f32 %v711_v19, %v692_v1  ;;  %v726_v11 = vadd.f32 %v709_v48, %v691_v22  ;;  %v750_v10 = vsel %vm743_vm2, %v737_v24, -inf  ;;  %v724_v26 = vadd.f32 %v1612_v25, %v689_v41 }
 0x20a   : > { %751 = vmax.xlane.f32.xlu0 %v750_v10  ;;  %v738_v0 = vadd.f32 %v1626_v60, %v723_v3 }
 0x20b   : > { %v739_v40 = vadd.f32 %v1626_v60, %v724_v26  ;;  %v742_v21 = vadd.f32 %v1626_v60, %v727_v54  ;;  %v741_v2 = vadd.f32 %v1626_v60, %v726_v11 }
 0x20c   : > { %v753_v32 = vsel %vm743_vm2, %v738_v0, -inf }
 0x20d   : > { %v756_v29 = vsel %vm743_vm2, %v739_v40, -inf  ;;  %v765_v33 = vsel %vm743_vm2, %v742_v21, -inf  ;;  %v762_v35 = vsel %vm743_vm2, %v741_v2, -inf }
 0x20e   : > { %757 = vmax.xlane.f32.xlu1 %v756_v29  ;;  %754 = vmax.xlane.f32.xlu0 %v753_v32 }
 0x212   : > { %766 = vmax.xlane.f32.xlu0 %v765_v33  ;;  %763 = vmax.xlane.f32.xlu1 %v762_v35 }
 0x26b   : > { %v746_v25 = vpop.xlane.xlu0 %745 }
 0x26c   : > { %v768_v8 = vsub.f32 %v1629_v61, %v746_v25 }
 0x26e   : > { %v776_v38 = vmul.f32 1.442695, %v768_v8 }
 0x26f   : > { %v761_v7 = vpop.xlane.xlu0 %760 }
 0x270   : > { %1131 = vpow2.f32 %v776_v38  ;;  %v773_v15 = vsub.f32 %v1635_v9, %v761_v7 }
 0x272   : > { %v786_v28 = vmul.f32 1.442695, %v773_v15 }
 0x274   : > { %1133 = vpow2.f32 %v786_v28 }
 0x27d   : > { %v1132_v30 = vpop.eup %1131 }
 0x27e   : > { %v792_v60 = vsel %vm743_vm2, %v1132_v30, 0.0 }
 0x27f   : > { %v749_v43 = vpop.xlane.xlu1 %748  ;;  %793 = vadd.xlane.f32.xlu1 %v792_v60 }
 0x280   : > { %v769_v44 = vsub.f32 %v1640_v36, %v749_v43 }
 0x281   : > { %v1134_v45 = vpop.eup %1133 }
 0x282   : > { %v778_v46 = vmul.f32 1.442695, %v769_v44  ;;  %v807_v47 = vsel %vm743_vm2, %v1134_v45, 0.0 }
 0x283   : > { %808 = vadd.xlane.f32.xlu0 %v807_v47 }
 0x284   : > { %1135 = vpow2.f32 %v778_v46 }
 0x291   : > { %v1136_v61 = vpop.eup %1135 }
 0x292   : > { %v795_v50 = vsel %vm743_vm2, %v1136_v61, 0.0 }
 0x293   : > { %796 = vadd.xlane.f32.xlu0 %v795_v50  ;;  %v752_v9 = vpop.xlane.xlu0 %751 }
 0x294   : > { %v770_v51 = vsub.f32 %v737_v24, %v752_v9 }
 0x296   : > { %v780_v52 = vmul.f32 1.442695, %v770_v51 }
 0x297   : > { %v758_v56 = vpop.xlane.xlu1 %757  ;;  %v755_v57 = vpop.xlane.xlu0 %754 }
 0x298   : > { %1137 = vpow2.f32 %v780_v52  ;;  %v772_v39 = vsub.f32 %v739_v40, %v758_v56  ;;  %v771_v58 = vsub.f32 %v738_v0, %v755_v57 }
 0x29a   : > { %v784_v5 = vmul.f32 1.442695, %v772_v39  ;;  %v782_v36 = vmul.f32 1.442695, %v771_v58 }
 0x29b   : > { %v764_v20 = vpop.xlane.xlu1 %763  ;;  %v767_v31 = vpop.xlane.xlu0 %766 }
 0x29c   : > { %1139 = vpow2.f32 %v784_v5  ;;  %v774_v23 = vsub.f32 %v741_v2, %v764_v20  ;;  %v775_v53 = vsub.f32 %v742_v21, %v767_v31 }
 0x29d   : > { %1141 = vpow2.f32 %v782_v36 }
 0x29e   : > { %v788_v59 = vmul.f32 1.442695, %v774_v23  ;;  %v790_v62 = vmul.f32 1.442695, %v775_v53 }
 0x2a0   : > { %1143 = vpow2.f32 %v788_v59 }
 0x2a1   : > { %1145 = vpow2.f32 %v790_v62 }
 0x2a5   : > { %v1138_v37 = vpop.eup %1137 }
 0x2a6   : > { %v798_v63 = vsel %vm743_vm2, %v1138_v37, 0.0 }
 0x2a7   : > { %799 = vadd.xlane.f32.xlu1 %v798_v63 }
 0x2a9   : > { %v1140_v4 = vpop.eup %1139 }
 0x2aa   : > { %v1142_v6 = vpop.eup %1141  ;;  %v804_v13 = vsel %vm743_vm2, %v1140_v4, 0.0 }
 0x2ab   : > { %805 = vadd.xlane.f32.xlu1 %v804_v13  ;;  %v801_v16 = vsel %vm743_vm2, %v1142_v6, 0.0 }
 0x2ac   : > { %802 = vadd.xlane.f32.xlu0 %v801_v16 }
 0x2ad   : > { %v1144_v27 = vpop.eup %1143 }
 0x2ae   : > { %v1146_v55 = vpop.eup %1145  ;;  %v810_v42 = vsel %vm743_vm2, %v1144_v27, 0.0 }
 0x2af   : > { %811 = vadd.xlane.f32.xlu1 %v810_v42  ;;  %v813_v14 = vsel %vm743_vm2, %v1146_v55, 0.0 }
 0x2b0   : > { %814 = vadd.xlane.f32.xlu0 %v813_v14 }
 0x308   : > { %v794_v49 = vpop.xlane.xlu1 %793 }
 0x309   : > { %1147 = vrcp.f32 %v794_v49 }
 0x30c   : > { %v809_v17 = vpop.xlane.xlu0 %808 }
 0x30d   : > { %1149 = vrcp.f32 %v809_v17 }
 0x316   : > { %v1148_v34 = vpop.eup %1147 }
 0x317   : > { %v824_v18 = vmul.f32 %v1148_v34, %v1132_v30 }
 0x319   : > { %832 = vst.msk [vmem:[%s1684_s26] sm:$0xff] %vm743_vm2, %v824_v18 }
 0x31a   : > { %v1150_v12 = vpop.eup %1149 }
 0x31b   : > { %v829_v22 = vmul.f32 %v1150_v12, %v1134_v45 }
 0x31c   : > { %v797_v1 = vpop.xlane.xlu0 %796 }
 0x31d   : > { %837 = vst.msk [vmem:[%s1684_s26 + $0x28] sm:$0xff] %vm743_vm2, %v829_v22  ;;  %1151 = vrcp.f32 %v797_v1 }
 0x32a   : > { %v1152_v24 = vpop.eup %1151 }
 0x32b   : > { %v825_v41 = vmul.f32 %v1152_v24, %v1136_v61 }
 0x32d   : > { %833 = vst.msk [vmem:[%s1684_s26 + $0x8] sm:$0xff] %vm743_vm2, %v825_v41 }
 0x330   : > { %v800_v3 = vpop.xlane.xlu1 %799 }
 0x331   : > { %1153 = vrcp.f32 %v800_v3 }
 0x334   : > { %v806_v19 = vpop.xlane.xlu1 %805 }
 0x335   : > { %1155 = vrcp.f32 %v806_v19  ;;  %v803_v48 = vpop.xlane.xlu0 %802 }
 0x336   : > { %1157 = vrcp.f32 %v803_v48 }
 0x338   : > { %v812_v54 = vpop.xlane.xlu1 %811 }
 0x339   : > { %1159 = vrcp.f32 %v812_v54  ;;  %v815_v11 = vpop.xlane.xlu0 %814 }
 0x33a   : > { %1161 = vrcp.f32 %v815_v11 }
 0x33e   : > { %v1154_v10 = vpop.eup %1153 }
 0x33f   : > { %v826_v26 = vmul.f32 %v1154_v10, %v1138_v37 }
 0x341   : > { %834 = vst.msk [vmem:[%s1684_s26 + $0x10] sm:$0xff] %vm743_vm2, %v826_v26 }
 0x342   : > { %v1156_v0 = vpop.eup %1155 }
 0x343   : > { %v1158_v40 = vpop.eup %1157  ;;  %v828_v29 = vmul.f32 %v1156_v0, %v1140_v4 }
 0x344   : > { %v827_v32 = vmul.f32 %v1158_v40, %v1142_v6 }
 0x345   : > { %836 = vst.msk [vmem:[%s1684_s26 + $0x20] sm:$0xff] %vm743_vm2, %v828_v29 }
 0x346   : > { %v1160_v21 = vpop.eup %1159  ;;  %835 = vst.msk [vmem:[%s1684_s26 + $0x18] sm:$0xff] %vm743_vm2, %v827_v32 }
 0x347   : > { %v1162_v2 = vpop.eup %1161  ;;  %v830_v33 = vmul.f32 %v1160_v21, %v1144_v27 }
 0x348   : > { %v831_v35 = vmul.f32 %v1162_v2, %v1146_v55 }
 0x349   : > { %838 = vst.msk [vmem:[%s1684_s26 + $0x30] sm:$0xff] %vm743_vm2, %v830_v33 }
 0x34a   : > { %839 = vst.msk [vmem:[%s1684_s26 + $0x38] sm:$0xff] %vm743_vm2, %v831_v35 }
 0x34b   : > { %1204 = shalt.err (!%p1201_p10)
}
 0x34c   : > { %s1205_s7 = scalar_lea.hbm %s1703_s9, 1024  ;;  %s1209_s22 = scalar_lea.hbm %s1755_s3, 2048 }
 0x34d   : > { %p1206_p0 = scmp.ne.s32.totalorder %s1703_s9, %s1205_s7  ;;  %p1210_p1 = scmp.lt.s32.totalorder %s1703_s9, %s1755_s3 }
 0x34e   : > { %p1211_p3 = scmp.lt.s32.totalorder %s1209_s22, %s1205_s7 }
 0x34f   : > { %p1207_p2 = pnand %p1206_p0, %p1763_p12 }
 0x350   : > { %p1212_p6 = por %p1211_p3, %p1210_p1 }
 0x351   : > { %p1208_p9 = pneg %p1207_p2 }
 0x353   : > { %p1213_p11 = pnand %p1212_p6, %p1208_p9 }
 0x355   : > { %1216 = shalt.err (!%p1213_p11)
}
 0x356   : > { %s1269_s25 = smov 128   ;;  %s1270_s26 = smov 8  }
 0x357   : > { %1075 = dma.vmem_to_hbm [thread:$0]  (%p1763_p12), %s1705_s28, 1024, %s1703_s9, %s841_s16, %s1269_s25, %s1269_s25, %s1270_s26  }
 0x358 PF: > { %s869_s27 = sand.u32 1, %s1243_s12   ;;  %p1764_p13 = scmp.ne.s32.totalorder %s1760_s24, 0 }
 0x359   : > { %p1765_p4 = scmp.ge.s32.totalorder %s1255_s15, 2  ;;  %s870_s29 = scalar_lea.sflag [#allocation4], %s869_s27 }
 0x35b   : > { %p1082_p5 = pnand %p1765_p4, %p1764_p13 }
 0x35d   : > { %p1083_p7 = pneg %p1082_p5 }
 0x35f   : > { %1238 = dma.done.wait (%p1083_p7), %s870_s29, 1024  }
 0x360   : > { %1240 = vsyncadd (%p1083_p7), %s870_s29, 4294966272  ;;  %p16_p8 = scmp.ge.s32.totalorder %s1316_s18, 4   ;;  %s1766_s12 = smov %s1247_s13 }
 0x361   : > { %s1767_s13 = smov %s1251_s14  ;;  %s1768_s14 = smov %s1328_s21 }
 0x362   : > { %s1769_s15 = smov %s1316_s18  ;;  %18 = sbr.rel (!%p16_p8) target bundleno = 5 (0x5), region = 77 }
 0x367   :  { %875 = vsyncpa [#allocation3], 1 }
 0x368   :  { %877 = vsyncpa [#allocation3 + $0x1], 1 }
 0x369   :  { %878 = vsyncpa [#allocation4], 1 }
 0x36a   :  { %880 = vsyncpa [#allocation4 + $0x1], 1 }

</bundles_post_ra>
